<compile_context>
chip_gen: v7x
topology: tpu7x:2x2x1
jax: 0.10.0
libtpu: 0.0.40
codegen_flags: <defaults>
</compile_context>

<pallas_src>
import jax
import jax.numpy as jnp
from jax.experimental import pallas as pl
from jax.experimental.pallas import tpu as pltpu


# ---------------------------------------------------------------------------
# Kernel: transposed layout, batch on lanes.
#   o (4, Bt) = W (4, 16) @ xT (16, Bt) + b (4, 1)
# ---------------------------------------------------------------------------
def _linear_t_kernel(xt_ref, w_ref, b_ref, o_ref):
    xt = xt_ref[...]                                         # (16, Bt)
    w = w_ref[...]                                           # (4, 16)
    b = b_ref[...]                                           # (4, 1)
    y = jnp.dot(w, xt, preferred_element_type=jnp.float32)   # MXU, f32 acc
    o_ref[...] = (y + b).astype(o_ref.dtype)                 # bias broadcast over lanes


# ---------------------------------------------------------------------------
# Small batch: whole problem in VMEM, no grid (no pipelining machinery).
# ---------------------------------------------------------------------------
def _forward_small(xt, w, b):
    B = xt.shape[1]
    return pl.pallas_call(
        _linear_t_kernel,
        out_shape=jax.ShapeDtypeStruct((4, B), jnp.float32),
        in_specs=[
            pl.BlockSpec(memory_space=pltpu.MemorySpace.VMEM),
            pl.BlockSpec(memory_space=pltpu.MemorySpace.VMEM),
            pl.BlockSpec(memory_space=pltpu.MemorySpace.VMEM),
        ],
        out_specs=pl.BlockSpec(memory_space=pltpu.MemorySpace.VMEM),
    )(xt, w, b)


# ---------------------------------------------------------------------------
# Large batch: tile the batch (lane dim), pipeline DMAs, parallel batch axis.
# B must be a multiple of bt (wrapper pads).
# ---------------------------------------------------------------------------
def _forward_tiled(xt, w, b, *, bt):
    B = xt.shape[1]
    grid = (B // bt,)
    return pl.pallas_call(
        _linear_t_kernel,
        out_shape=jax.ShapeDtypeStruct((4, B), jnp.float32),
        grid_spec=pltpu.PrefetchScalarGridSpec(
            num_scalar_prefetch=0,
            grid=grid,
            in_specs=[
                pl.BlockSpec((16, bt), lambda i: (0, i)),    # x_T batch tile
                pl.BlockSpec((4, 16), lambda i: (0, 0)),     # weight, resident
                pl.BlockSpec((4, 1), lambda i: (0, 0)),      # bias, resident
            ],
            out_specs=pl.BlockSpec((4, bt), lambda i: (0, i)),
        ),
        compiler_params=pltpu.CompilerParams(
            dimension_semantics=("parallel",)),              # megacore on v7x
    )(xt, w, b)


class Game2048NNPallas:
    """Pre-converts parameters once (hoisted out of the per-call path)."""

    def __init__(self, weight, bias, *, batch_tile=512):
        # PyTorch weight layout (out=4, in=16) is already what the transposed
        # kernel consumes — no transpose. Bias stored as a (4, 1) column.
        self.w = jnp.asarray(weight, jnp.float32)            # (4, 16)
        self.b = jnp.asarray(bias, jnp.float32).reshape(4, 1)
        self.batch_tile = int(batch_tile)                    # multiple of 128
        self._fwd = jax.jit(self._forward)

    def _forward(self, x):
        x = x.astype(jnp.float32)
        B = x.shape[0]
        xt = x.T                                             # (16, B): batch -> lanes
        if B < self.batch_tile:
            yt = _forward_small(xt, self.w, self.b)
        else:
            bt = self.batch_tile
            pad = (-B) % bt
            if pad:
                xt = jnp.pad(xt, ((0, 0), (0, pad)))
            yt = _forward_tiled(xt, self.w, self.b, bt=bt)
            if pad:
                yt = yt[:, :B]
        return yt.T                                          # (B, 4) PyTorch layout

    def __call__(self, x):
        return self._fwd(x)


def _reference(x, weight, bias):
    return x @ weight.T + bias


if __name__ == "__main__":
    key = jax.random.PRNGKey(0)
    kx, kw, kb, kx2 = jax.random.split(key, 4)

    # Deterministic PyTorch-like init: uniform(-1/sqrt(fan_in), 1/sqrt(fan_in))
    bound = 1.0 / jnp.sqrt(16.0)
    weight = jax.random.uniform(kw, (4, 16), minval=-bound, maxval=bound,
                                dtype=jnp.float32)
    bias = jax.random.uniform(kb, (4,), minval=-bound, maxval=bound,
                              dtype=jnp.float32)

    model = Game2048NNPallas(weight, bias)

    # --- small batch (no-grid path) ---
    B_small = 8
    x_small = jax.random.normal(kx, (B_small, 16), dtype=jnp.float32)
    out_small = jax.block_until_ready(model(x_small))
    ref_small = _reference(x_small, weight, bias)
    assert out_small.shape == (B_small, 4)
    assert jnp.allclose(out_small, ref_small, atol=1e-5, rtol=1e-5)

    # --- large batch (tiled + parallel path, non-multiple of tile -> padding) ---
    B_large = 1088
    x_large = jax.random.normal(kx2, (B_large, 16), dtype=jnp.float32)
    out_large = jax.block_until_ready(model(x_large))
    ref_large = _reference(x_large, weight, bias)
    assert out_large.shape == (B_large, 4)
    assert jnp.allclose(out_large, ref_large, atol=1e-4, rtol=1e-5)

    print("KERNEL_OK")
</pallas_src>

<mosaic_0001>
module attributes {stable_mosaic.version = 11 : i64} {
  func.func @_linear_t_kernel(%arg0: memref<16x8xf32, #tpu.memory_space<vmem>>, %arg1: memref<4x16xf32, #tpu.memory_space<vmem>>, %arg2: memref<4x1xf32, #tpu.memory_space<vmem>>, %arg3: memref<4x8xf32, #tpu.memory_space<vmem>>) attributes {dimension_semantics = [], scalar_prefetch = 0 : i64, scratch_operands = 0 : i64, tpu.core_type = #tpu.core_type<tc>} {
    %c0 = arith.constant 0 : index
    %c0_0 = arith.constant 0 : index
    %0 = vector.load %arg0[%c0, %c0_0] : memref<16x8xf32, #tpu.memory_space<vmem>>, vector<16x8xf32>
    %c0_1 = arith.constant 0 : index
    %c0_2 = arith.constant 0 : index
    %1 = vector.load %arg1[%c0_1, %c0_2] : memref<4x16xf32, #tpu.memory_space<vmem>>, vector<4x16xf32>
    %c0_3 = arith.constant 0 : index
    %c0_4 = arith.constant 0 : index
    %2 = vector.load %arg2[%c0_3, %c0_4] : memref<4x1xf32, #tpu.memory_space<vmem>>, vector<4x1xf32>
    %cst = arith.constant dense<0.000000e+00> : vector<4x8xf32>
    %3 = tpu.matmul %1, %0, %cst {dimension_numbers = #tpu.dot_dimension_numbers<[1], [0], [0], [1], [0, 0, 1, 1], [], []>} : vector<4x16xf32>, vector<16x8xf32>, vector<4x8xf32> -> vector<4x8xf32>
    %4 = vector.broadcast %2 : vector<4x1xf32> to vector<4x8xf32>
    %5 = arith.addf %3, %4 : vector<4x8xf32>
    %c0_5 = arith.constant 0 : index
    %c0_6 = arith.constant 0 : index
    %6 = vector.load %arg3[%c0_5, %c0_6] : memref<4x8xf32, #tpu.memory_space<vmem>>, vector<4x8xf32>
    tpu.vector_store %arg3[%c0_5, %c0_6], %5 {strides = array<i32>} : memref<4x8xf32, #tpu.memory_space<vmem>>, vector<4x8xf32>,
    return
  }
}

</mosaic_0001>

<bundles_post_ra>
// kernel: _forward.1
= control target key start
LH: loop header
LB: loop body
LE: loop exit
PB: predicated region body
PF: predicated region fallthrough
CT: control target
= control target key end

     0   :  { %v158_v2 = vmov 0.0|0.0   ;;  %vm159_vm0 = vmmov 0   ;;  %v160_v4 = vmov 0.0   ;;  %v161_v6 = vmov 0   ;;  %s207_s0 = inlined_call_operand.vmem [shape: f32[16,8], index: 0, kind: input, shape index: {}]   ;;  %s208_s1 = inlined_call_operand.vmem [shape: f32[4,16], index: 1, kind: input, shape index: {}]   ;;  %s209_s2 = inlined_call_operand.vmem [shape: f32[4,1], index: 2, kind: input, shape index: {}]   ;;  %s210_s3 = inlined_call_operand.hbm [shape: f32[4,8], index: 3, kind: output, shape index: {}]  }
   0x1   :  { %v15_v0 = vld [vmem:[%s207_s0] sm:$0xff]  ;;  %v16_v1 = vld [vmem:[%s207_s0 + $0x8] sm:$0xff]  ;;  %125 = vmatprep.subr.bf16.mxu0 %v158_v2  ;;  %122 = vmatprep.mubr.msk.f32.mxu0 %vm159_vm0, %v160_v4 }
   0x2   :  { %v126_v3 = vpack.c.bf16 %v16_v1, %v15_v0  ;;  %v18_v5 = vld [vmem:[%s209_s2] sm:$0xf]  ;;  %133 = vset.pattern.permute.xlu0 %v161_v6 }
   0x3   :  { %8 = vsyncpa [#allocation3], 0  ;;  %v17_v7 = vld [vmem:[%s208_s1] sm:$0xf]  ;;  %vm24_vm1 = vcmask 130048   ;;  %21 = vperm.xlu0 %133, %v18_v5   ;;  %s162_s0 = smov [#allocation2]  }
   0x4   :  { %127 = vmatpush3.bf16.msra.mxu0 %v126_v3  ;;  %s106_s20 = sshll.u32 %s162_s0, 4  ;;  %vm98_vm2 = vcmask 60416   ;;  %s107_s20 = int_to_ptr.vmem [resolvable:$true] %s106_s20 }
   0x5   :  { %s134_s2 = scalar_lea.vmem %s107_s20, 64  ;;  %p139_p1 = scmp.lt.s32.totalorder %s107_s20, %s107_s20 }
   0x6   :  { %p135_p0 = scmp.ne.s32.totalorder %s107_s20, %s134_s2  ;;  %p140_p2 = scmp.lt.s32.totalorder %s134_s2, %s134_s2 }
   0x7   :  { %123 = vmatmul.mubr.msk.f32.vlgmr.msra.gmra.mrb[0].mxu0 %vm24_vm1, %v17_v7 }
   0x8   :  { %p141_p3 = por %p140_p2, %p139_p1 }
   0xa   :  { %p142_p4 = pnand %p141_p3, %p135_p0 }
  0x82   :  { %v22_v8 = vpop.permute.xlu0 %21 }
  0xda   :  { %v94_v9 = vpop.f32.mrb[0].mxu0 }
  0xdb   :  { %v95_v10 = vadd.f32 %v94_v9, %v22_v8  ;;  %v124_v11 = vpop.f32.mrb[1].mxu0 }
  0xdd   :  { %99 = vst.msk [vmem:[#allocation2] sm:$0xf] %vm98_vm2, %v95_v10 }
  0xde   :  { %145 = shalt.err (!%p142_p4)
}
  0xdf   :  { %s146_s22 = scalar_lea.hbm %s210_s3, 64 }
  0xe0   :  { %p147_p5 = scmp.ne.s32.totalorder %s210_s3, %s146_s22  ;;  %p150_p6 = scmp.lt.u32.totalorder %s146_s22, %s210_s3 }
  0xe2   :  { %p152_p7 = pnand %p150_p6, %p147_p5 }
  0xe4   :  { %155 = shalt.err (!%p152_p7)
}
  0xe5   :  { %109 = dma.vmem_to_hbm [thread:$0]  %s107_s20, 64, %s210_s3, [#allocation3]  }
  0xe6   :  { %156 = dma.done.wait [#allocation3], 64  }
  0xe7   :  { %157 = vsyncadd [#allocation3], 4294967232 }
  0xe8   :  { %113 = vsyncpa [#allocation3], 1 }

</bundles_post_ra>
